<compile_context>
chip_gen: v6e
topology: v6e:2x2x1
jax: 0.10.0
libtpu: 0.0.40
codegen_flags: <defaults>
</compile_context>

<pallas_src>
import functools
import math

import jax
import jax.numpy as jnp
from jax.experimental import pallas as pl
from jax.experimental.pallas import tpu as pltpu


def _moe_gate_kernel(x_ref, w_ref, idx_ref, wgt_ref, *,
                     top_k, n_experts, norm_topk_prob):
    x = x_ref[...]                                  # (tn, h)     native dtype
    w = w_ref[...]                                  # (h, E_pad)  native dtype

    # Canonical (M,K)x(K,N) MXU contraction with f32 accumulation.
    logits = jnp.dot(x, w, preferred_element_type=jnp.float32)   # (tn, E_pad)

    e_pad = logits.shape[-1]
    col = jax.lax.broadcasted_iota(jnp.int32, logits.shape, 1)   # (tn, E_pad)
    neg_inf = float("-inf")

    # Mask padded expert columns so they never win top-k.
    if e_pad > n_experts:
        logits = jnp.where(col < n_experts, logits, neg_inf)

    # Iterative top-k (k small & static): pick max, record the first index
    # holding the max (matches torch/lax tie-breaking), mask it out.
    cur = logits
    vals = []
    idxs = []
    for _ in range(top_k):
        m = jnp.max(cur, axis=-1, keepdims=True)                   # (tn, 1)
        i = jnp.min(jnp.where(cur == m, col, e_pad), axis=-1, keepdims=True)
        vals.append(m)
        idxs.append(i)
        cur = jnp.where(col == i, neg_inf, cur)

    v = jnp.concatenate(vals, axis=-1)                             # (tn, k) f32
    idx = jnp.concatenate(idxs, axis=-1)                           # (tn, k) i32

    # Vectorized softmax over the k selected logits (single (tn, k) pass).
    # v[:, :1] is the global max by construction, so no extra max-reduce.
    e = jnp.exp(v - v[:, :1])
    probs = e / jnp.sum(e, axis=-1, keepdims=True)

    if top_k > 1 and norm_topk_prob:
        probs = probs / (jnp.sum(probs, axis=-1, keepdims=True) + 1e-20)

    # One lane-dense store per output ref.
    idx_ref[...] = idx
    wgt_ref[...] = probs.astype(wgt_ref.dtype)


def _vmem_caps():
    """(vmem_limit_bytes, tile_budget_bytes) derived from the hardware.

    Never requests the full physical VMEM (leave headroom for Mosaic internal
    scratch / semaphores): ~48 MiB limit on v7x (64 MiB physical), ~96 MiB on
    v5e/v6e (128 MiB physical).  Falls back to the conservative v7x numbers if
    the hardware query is unavailable.
    """
    try:
        cap = int(pltpu.get_tpu_info().vmem_capacity_bytes)
    except Exception:
        cap = 64 * 1024 * 1024
    limit = max((3 * cap) // 4, 32 * 1024 * 1024)
    budget = max(limit - 8 * 1024 * 1024, 16 * 1024 * 1024)
    return limit, budget


def moe_gate(hidden_states, weight, *, top_k, norm_topk_prob=True,
             row_tile=1024):
    """Pallas MoEGate forward.

    hidden_states: (bsz, seq_len, h) float (f32 or bf16; kept in native dtype)
    weight:        (n_routed_experts, h) float (torch nn.Linear-style gate)
    returns (topk_idx [N, top_k] int32, topk_weight [N, top_k] f32, None)
    """
    bsz, seq_len, h = hidden_states.shape
    n_experts = weight.shape[0]
    N = bsz * seq_len

    x = hidden_states.reshape(N, h)

    # Pad the expert dim to a multiple of 128 lanes (masked to -inf in-kernel)
    # and pre-transpose ONCE so the kernel does a plain (tn,h)x(h,E_pad) dot.
    e_pad = ((n_experts + 127) // 128) * 128
    if e_pad != n_experts:
        weight = jnp.pad(weight, ((0, e_pad - n_experts), (0, 0)))
    w_t = weight.T                                               # (h, E_pad)

    x_elem = jnp.dtype(x.dtype).itemsize
    w_elem = jnp.dtype(w_t.dtype).itemsize

    vmem_limit, vmem_budget = _vmem_caps()

    def _vmem_estimate(t):
        x_bytes = 2 * t * h * x_elem          # double-buffered input tile
        w_bytes = e_pad * h * w_elem          # resident weight (single-buffer)
        out_bytes = 2 * 2 * t * top_k * 4     # double-buffered idx+wgt tiles
        tmp_bytes = 6 * t * e_pad * 4         # logits / iota / top-k temps
        return x_bytes + w_bytes + out_bytes + tmp_bytes

    # Row tile: start big (amortize ~0.35us/step and issue bigger DMAs),
    # shrink to the VMEM budget, clamp to the problem size.
    tn = max(8, (row_tile // 8) * 8)
    while tn > 64 and _vmem_estimate(tn) > vmem_budget:
        tn //= 2
    if N <= tn:
        tn = N            # single block spanning the full row extent

    # Boundary block (if any) is masked by Pallas: OOB rows read garbage (the
    # per-row math tolerates it) and their output writes are clipped.
    grid = (pl.cdiv(N, tn),)

    kernel = functools.partial(
        _moe_gate_kernel,
        top_k=top_k,
        n_experts=n_experts,
        norm_topk_prob=norm_topk_prob,
    )

    def _call(single_buffer_weight):
        if single_buffer_weight:
            w_spec = pl.BlockSpec((h, e_pad), lambda i: (0, 0),
                                  pipeline_mode=pl.Buffered(1))
        else:
            w_spec = pl.BlockSpec((h, e_pad), lambda i: (0, 0))
        return pl.pallas_call(
            kernel,
            out_shape=(
                jax.ShapeDtypeStruct((N, top_k), jnp.int32),
                jax.ShapeDtypeStruct((N, top_k), jnp.float32),
            ),
            grid_spec=pltpu.PrefetchScalarGridSpec(
                num_scalar_prefetch=0,
                grid=grid,
                in_specs=[
                    pl.BlockSpec((tn, h), lambda i: (i, 0)),
                    w_spec,
                ],
                out_specs=[
                    pl.BlockSpec((tn, top_k), lambda i: (i, 0)),
                    pl.BlockSpec((tn, top_k), lambda i: (i, 0)),
                ],
            ),
            compiler_params=pltpu.CompilerParams(
                dimension_semantics=("parallel",),
                vmem_limit_bytes=vmem_limit,
            ),
        )(x, w_t)

    try:
        topk_idx, topk_wgt = _call(True)
    except Exception:
        # Installed JAX may not accept a per-BlockSpec buffer count; the
        # double-buffered weight fallback is semantically identical.
        topk_idx, topk_wgt = _call(False)

    aux_loss = None  # eval-mode semantics
    return topk_idx, topk_wgt, aux_loss


def _reference(hidden_states, weight, *, top_k, norm_topk_prob=True):
    bsz, seq_len, h = hidden_states.shape
    x = hidden_states.reshape(-1, h).astype(jnp.float32)
    logits = x @ weight.astype(jnp.float32).T
    vals, idx = jax.lax.top_k(logits, top_k)
    w = jax.nn.softmax(vals, axis=-1)
    if top_k > 1 and norm_topk_prob:
        w = w / (jnp.sum(w, axis=-1, keepdims=True) + 1e-20)
    return idx.astype(jnp.int32), w


if __name__ == "__main__":
    key = jax.random.PRNGKey(0)

    def run_case(bsz, seq_len, hidden, n_routed_experts, top_k,
                 norm_topk_prob, subkey, row_tile=1024):
        k_x, k_w = jax.random.split(subkey)
        hidden_states = jax.random.normal(
            k_x, (bsz, seq_len, hidden), jnp.float32)
        # kaiming_uniform_(a=sqrt(5)) on (E, h) -> U(-1/sqrt(h), 1/sqrt(h))
        bound = 1.0 / math.sqrt(hidden)
        weight = jax.random.uniform(
            k_w, (n_routed_experts, hidden), jnp.float32,
            minval=-bound, maxval=bound)

        topk_idx, topk_weight, aux_loss = moe_gate(
            hidden_states, weight, top_k=top_k,
            norm_topk_prob=norm_topk_prob, row_tile=row_tile)
        jax.block_until_ready((topk_idx, topk_weight))

        ref_idx, ref_w = _reference(
            hidden_states, weight, top_k=top_k,
            norm_topk_prob=norm_topk_prob)
        N = bsz * seq_len
        assert topk_idx.shape == (N, top_k)
        assert topk_weight.shape == (N, top_k)
        assert jnp.array_equal(topk_idx, ref_idx), "top-k indices mismatch"
        assert jnp.allclose(topk_weight, ref_w, atol=1e-5, rtol=1e-5), \
            "weights mismatch"
        assert aux_loss is None

    k1, k2, k3 = jax.random.split(key, 3)
    # Small config consistent with the module.
    run_case(bsz=2, seq_len=8, hidden=32, n_routed_experts=8,
             top_k=2, norm_topk_prob=True, subkey=k1)
    # Ragged row count that fits a single block + more experts / larger k.
    run_case(bsz=3, seq_len=5, hidden=64, n_routed_experts=16,
             top_k=4, norm_topk_prob=True, subkey=k2)
    # Ragged boundary block across a multi-step grid (exercises the
    # no-padding masked-boundary path introduced in this revision).
    run_case(bsz=3, seq_len=9, hidden=32, n_routed_experts=8,
             top_k=2, norm_topk_prob=True, subkey=k3, row_tile=8)

    print("KERNEL_OK")
</pallas_src>

<mosaic_0001>
module attributes {stable_mosaic.version = 11 : i64} {
  func.func @_moe_gate_kernel(%arg0: i32, %arg1: memref<16x32xf32, #tpu.memory_space<vmem>>, %arg2: memref<32x128xf32, #tpu.memory_space<vmem>>, %arg3: memref<16x2xi32, #tpu.memory_space<vmem>>, %arg4: memref<16x2xf32, #tpu.memory_space<vmem>>) attributes {dimension_semantics = [#tpu.dimension_semantics<parallel>], iteration_bounds = array<i64: 1>, scalar_prefetch = 0 : i64, scratch_operands = 0 : i64, tpu.core_type = #tpu.core_type<tc>, window_params = [{transform_indices = @transform_0, window_bounds = array<i64: 16, 32>}, {pipeline_mode = #tpu.pipeline_mode<synchronous>, transform_indices = @transform_1, window_bounds = array<i64: 32, 128>}, {transform_indices = @transform_2, window_bounds = array<i64: 16, 2>}, {transform_indices = @transform_3, window_bounds = array<i64: 16, 2>}]} {
    %c0 = arith.constant 0 : index
    %c0_0 = arith.constant 0 : index
    %0 = vector.load %arg1[%c0, %c0_0] : memref<16x32xf32, #tpu.memory_space<vmem>>, vector<16x32xf32>
    %c0_1 = arith.constant 0 : index
    %c0_2 = arith.constant 0 : index
    %1 = vector.load %arg2[%c0_1, %c0_2] : memref<32x128xf32, #tpu.memory_space<vmem>>, vector<32x128xf32>
    %cst = arith.constant dense<0.000000e+00> : vector<16x128xf32>
    %2 = tpu.matmul %0, %1, %cst {dimension_numbers = #tpu.dot_dimension_numbers<[1], [0], [0], [1], [0, 0, 1, 1], [], []>} : vector<16x32xf32>, vector<32x128xf32>, vector<16x128xf32> -> vector<16x128xf32>
    %3 = tpu.iota {dimensions = array<i32: 1>} : vector<16x128xi32>
    %c8_i32 = arith.constant 8 : i32
    %4 = vector.broadcast %c8_i32 : i32 to vector<16x128xi32>
    %5 = arith.cmpi slt, %3, %4 : vector<16x128xi32>
    %cst_3 = arith.constant 0xFF800000 : f32
    %6 = vector.broadcast %cst_3 : f32 to vector<16x128xf32>
    %7 = arith.select %5, %2, %6 : vector<16x128xi1>, vector<16x128xf32>
    %cst_4 = arith.constant dense<0xFF800000> : vector<16xf32>
    %8 = vector.multi_reduction <maximumf>, %7, %cst_4 [1] : vector<16x128xf32> to vector<16xf32>
    %9 = vector.shape_cast %8 : vector<16xf32> to vector<16x1xf32>
    %10 = vector.broadcast %9 : vector<16x1xf32> to vector<16x128xf32>
    %11 = arith.cmpf oeq, %7, %10 : vector<16x128xf32>
    %c128_i32 = arith.constant 128 : i32
    %12 = vector.broadcast %c128_i32 : i32 to vector<16x128xi32>
    %13 = arith.select %11, %3, %12 : vector<16x128xi1>, vector<16x128xi32>
    %cst_5 = arith.constant dense<2147483647> : vector<16xi32>
    %14 = vector.multi_reduction <minsi>, %13, %cst_5 [1] : vector<16x128xi32> to vector<16xi32>
    %15 = vector.shape_cast %14 : vector<16xi32> to vector<16x1xi32>
    %16 = vector.broadcast %15 : vector<16x1xi32> to vector<16x128xi32>
    %17 = arith.cmpi eq, %3, %16 : vector<16x128xi32>
    %cst_6 = arith.constant 0xFF800000 : f32
    %18 = vector.broadcast %cst_6 : f32 to vector<16x128xf32>
    %19 = arith.select %17, %18, %7 : vector<16x128xi1>, vector<16x128xf32>
    %cst_7 = arith.constant dense<0xFF800000> : vector<16xf32>
    %20 = vector.multi_reduction <maximumf>, %19, %cst_7 [1] : vector<16x128xf32> to vector<16xf32>
    %21 = vector.shape_cast %20 : vector<16xf32> to vector<16x1xf32>
    %22 = vector.broadcast %21 : vector<16x1xf32> to vector<16x128xf32>
    %23 = arith.cmpf oeq, %19, %22 : vector<16x128xf32>
    %c128_i32_8 = arith.constant 128 : i32
    %24 = vector.broadcast %c128_i32_8 : i32 to vector<16x128xi32>
    %25 = arith.select %23, %3, %24 : vector<16x128xi1>, vector<16x128xi32>
    %cst_9 = arith.constant dense<2147483647> : vector<16xi32>
    %26 = vector.multi_reduction <minsi>, %25, %cst_9 [1] : vector<16x128xi32> to vector<16xi32>
    %27 = vector.shape_cast %26 : vector<16xi32> to vector<16x1xi32>
    %28 = tpu.concatenate %9, %21 in 1 : vector<16x1xf32>, vector<16x1xf32> -> vector<16x2xf32>
    %29 = tpu.concatenate %15, %27 in 1 : vector<16x1xi32>, vector<16x1xi32> -> vector<16x2xi32>
    %30 = vector.extract_strided_slice %28 {offsets = [0, 0], sizes = [16, 1], strides = [1, 1]} : vector<16x2xf32> to vector<16x1xf32>
    %31 = vector.broadcast %30 : vector<16x1xf32> to vector<16x2xf32>
    %32 = arith.subf %28, %31 : vector<16x2xf32>
    %33 = math.exp %32 : vector<16x2xf32>
    %cst_10 = arith.constant dense<0.000000e+00> : vector<16xf32>
    %34 = vector.multi_reduction <add>, %33, %cst_10 [1] : vector<16x2xf32> to vector<16xf32>
    %35 = vector.shape_cast %34 : vector<16xf32> to vector<16x1xf32>
    %36 = vector.broadcast %35 : vector<16x1xf32> to vector<16x2xf32>
    %37 = arith.divf %33, %36 : vector<16x2xf32>
    %cst_11 = arith.constant dense<0.000000e+00> : vector<16xf32>
    %38 = vector.multi_reduction <add>, %37, %cst_11 [1] : vector<16x2xf32> to vector<16xf32>
    %39 = vector.shape_cast %38 : vector<16xf32> to vector<16x1xf32>
    %cst_12 = arith.constant 9.99999968E-21 : f32
    %40 = vector.broadcast %cst_12 : f32 to vector<16x1xf32>
    %41 = arith.addf %39, %40 : vector<16x1xf32>
    %42 = vector.broadcast %41 : vector<16x1xf32> to vector<16x2xf32>
    %43 = arith.divf %37, %42 : vector<16x2xf32>
    %c0_13 = arith.constant 0 : index
    %c0_14 = arith.constant 0 : index
    %44 = vector.load %arg3[%c0_13, %c0_14] : memref<16x2xi32, #tpu.memory_space<vmem>>, vector<16x2xi32>
    tpu.vector_store %arg3[%c0_13, %c0_14], %29 {strides = array<i32>} : memref<16x2xi32, #tpu.memory_space<vmem>>, vector<16x2xi32>,
    %c0_15 = arith.constant 0 : index
    %c0_16 = arith.constant 0 : index
    %45 = vector.load %arg4[%c0_15, %c0_16] : memref<16x2xf32, #tpu.memory_space<vmem>>, vector<16x2xf32>
    tpu.vector_store %arg4[%c0_15, %c0_16], %43 {strides = array<i32>} : memref<16x2xf32, #tpu.memory_space<vmem>>, vector<16x2xf32>,
    return
  }
  func.func @transform_0(%arg0: i32) -> (i32, i32) {
    %c0_i32 = arith.constant 0 : i32
    %c0_i32_0 = arith.constant 0 : i32
    return %arg0, %c0_i32 : i32, i32
  }
  func.func @transform_1(%arg0: i32) -> (i32, i32) {
    %c0_i32 = arith.constant 0 : i32
    %c0_i32_0 = arith.constant 0 : i32
    %c0_i32_1 = arith.constant 0 : i32
    return %c0_i32, %c0_i32_0 : i32, i32
  }
  func.func @transform_2(%arg0: i32) -> (i32, i32) {
    %c0_i32 = arith.constant 0 : i32
    %c0_i32_0 = arith.constant 0 : i32
    return %arg0, %c0_i32 : i32, i32
  }
  func.func @transform_3(%arg0: i32) -> (i32, i32) {
    %c0_i32 = arith.constant 0 : i32
    %c0_i32_0 = arith.constant 0 : i32
    return %arg0, %c0_i32 : i32, i32
  }
}

module attributes {stable_mosaic.version = 11 : i64} {
  func.func @_moe_gate_kernel(%arg0: i32, %arg1: memref<16x32xf32, #tpu.memory_space<vmem>>, %arg2: memref<32x128xf32, #tpu.memory_space<vmem>>, %arg3: memref<16x2xi32, #tpu.memory_space<vmem>>, %arg4: memref<16x2xf32, #tpu.memory_space<vmem>>) attributes {dimension_semantics = [#tpu.dimension_semantics<parallel>], iteration_bounds = array<i64: 1>, scalar_prefetch = 0 : i64, scratch_operands = 0 : i64, tpu.core_type = #tpu.core_type<tc>, window_params = [{transform_indices = @transform_0, window_bounds = array<i64: 16, 32>}, {pipeline_mode = #tpu.pipeline_mode<synchronous>, transform_indices = @transform_1, window_bounds = array<i64: 32, 128>}, {transform_indices = @transform_2, window_bounds = array<i64: 16, 2>}, {transform_indices = @transform_3, window_bounds = array<i64: 16, 2>}]} {
    %c0 = arith.constant 0 : index
    %c0_0 = arith.constant 0 : index
    %0 = vector.load %arg1[%c0, %c0_0] : memref<16x32xf32, #tpu.memory_space<vmem>>, vector<16x32xf32>
    %c0_1 = arith.constant 0 : index
    %c0_2 = arith.constant 0 : index
    %1 = vector.load %arg2[%c0_1, %c0_2] : memref<32x128xf32, #tpu.memory_space<vmem>>, vector<32x128xf32>
    %cst = arith.constant dense<0.000000e+00> : vector<16x128xf32>
    %2 = tpu.matmul %0, %1, %cst {dimension_numbers = #tpu.dot_dimension_numbers<[1], [0], [0], [1], [0, 0, 1, 1], [], []>} : vector<16x32xf32>, vector<32x128xf32>, vector<16x128xf32> -> vector<16x128xf32>
    %3 = tpu.iota {dimensions = array<i32: 1>} : vector<16x128xi32>
    %c8_i32 = arith.constant 8 : i32
    %4 = vector.broadcast %c8_i32 : i32 to vector<16x128xi32>
    %5 = arith.cmpi slt, %3, %4 : vector<16x128xi32>
    %cst_3 = arith.constant 0xFF800000 : f32
    %6 = vector.broadcast %cst_3 : f32 to vector<16x128xf32>
    %7 = arith.select %5, %2, %6 : vector<16x128xi1>, vector<16x128xf32>
    %cst_4 = arith.constant dense<0xFF800000> : vector<16xf32>
    %8 = vector.multi_reduction <maximumf>, %7, %cst_4 [1] : vector<16x128xf32> to vector<16xf32>
    %9 = vector.shape_cast %8 : vector<16xf32> to vector<16x1xf32>
    %10 = vector.broadcast %9 : vector<16x1xf32> to vector<16x128xf32>
    %11 = arith.cmpf oeq, %7, %10 : vector<16x128xf32>
    %c128_i32 = arith.constant 128 : i32
    %12 = vector.broadcast %c128_i32 : i32 to vector<16x128xi32>
    %13 = arith.select %11, %3, %12 : vector<16x128xi1>, vector<16x128xi32>
    %cst_5 = arith.constant dense<2147483647> : vector<16xi32>
    %14 = vector.multi_reduction <minsi>, %13, %cst_5 [1] : vector<16x128xi32> to vector<16xi32>
    %15 = vector.shape_cast %14 : vector<16xi32> to vector<16x1xi32>
    %16 = vector.broadcast %15 : vector<16x1xi32> to vector<16x128xi32>
    %17 = arith.cmpi eq, %3, %16 : vector<16x128xi32>
    %cst_6 = arith.constant 0xFF800000 : f32
    %18 = vector.broadcast %cst_6 : f32 to vector<16x128xf32>
    %19 = arith.select %17, %18, %7 : vector<16x128xi1>, vector<16x128xf32>
    %cst_7 = arith.constant dense<0xFF800000> : vector<16xf32>
    %20 = vector.multi_reduction <maximumf>, %19, %cst_7 [1] : vector<16x128xf32> to vector<16xf32>
    %21 = vector.shape_cast %20 : vector<16xf32> to vector<16x1xf32>
    %22 = vector.broadcast %21 : vector<16x1xf32> to vector<16x128xf32>
    %23 = arith.cmpf oeq, %19, %22 : vector<16x128xf32>
    %c128_i32_8 = arith.constant 128 : i32
    %24 = vector.broadcast %c128_i32_8 : i32 to vector<16x128xi32>
    %25 = arith.select %23, %3, %24 : vector<16x128xi1>, vector<16x128xi32>
    %cst_9 = arith.constant dense<2147483647> : vector<16xi32>
    %26 = vector.multi_reduction <minsi>, %25, %cst_9 [1] : vector<16x128xi32> to vector<16xi32>
    %27 = vector.shape_cast %26 : vector<16xi32> to vector<16x1xi32>
    %28 = tpu.concatenate %9, %21 in 1 : vector<16x1xf32>, vector<16x1xf32> -> vector<16x2xf32>
    %29 = tpu.concatenate %15, %27 in 1 : vector<16x1xi32>, vector<16x1xi32> -> vector<16x2xi32>
    %30 = vector.extract_strided_slice %28 {offsets = [0, 0], sizes = [16, 1], strides = [1, 1]} : vector<16x2xf32> to vector<16x1xf32>
    %31 = vector.broadcast %30 : vector<16x1xf32> to vector<16x2xf32>
    %32 = arith.subf %28, %31 : vector<16x2xf32>
    %33 = math.exp %32 : vector<16x2xf32>
    %cst_10 = arith.constant dense<0.000000e+00> : vector<16xf32>
    %34 = vector.multi_reduction <add>, %33, %cst_10 [1] : vector<16x2xf32> to vector<16xf32>
    %35 = vector.shape_cast %34 : vector<16xf32> to vector<16x1xf32>
    %36 = vector.broadcast %35 : vector<16x1xf32> to vector<16x2xf32>
    %37 = arith.divf %33, %36 : vector<16x2xf32>
    %cst_11 = arith.constant dense<0.000000e+00> : vector<16xf32>
    %38 = vector.multi_reduction <add>, %37, %cst_11 [1] : vector<16x2xf32> to vector<16xf32>
    %39 = vector.shape_cast %38 : vector<16xf32> to vector<16x1xf32>
    %cst_12 = arith.constant 9.99999968E-21 : f32
    %40 = vector.broadcast %cst_12 : f32 to vector<16x1xf32>
    %41 = arith.addf %39, %40 : vector<16x1xf32>
    %42 = vector.broadcast %41 : vector<16x1xf32> to vector<16x2xf32>
    %43 = arith.divf %37, %42 : vector<16x2xf32>
    %c0_13 = arith.constant 0 : index
    %c0_14 = arith.constant 0 : index
    %44 = vector.load %arg3[%c0_13, %c0_14] : memref<16x2xi32, #tpu.memory_space<vmem>>, vector<16x2xi32>
    tpu.vector_store %arg3[%c0_13, %c0_14], %29 {strides = array<i32>} : memref<16x2xi32, #tpu.memory_space<vmem>>, vector<16x2xi32>,
    %c0_15 = arith.constant 0 : index
    %c0_16 = arith.constant 0 : index
    %45 = vector.load %arg4[%c0_15, %c0_16] : memref<16x2xf32, #tpu.memory_space<vmem>>, vector<16x2xf32>
    tpu.vector_store %arg4[%c0_15, %c0_16], %43 {strides = array<i32>} : memref<16x2xf32, #tpu.memory_space<vmem>>, vector<16x2xf32>,
    return
  }
  func.func @transform_0(%arg0: i32) -> (i32, i32) {
    %c0_i32 = arith.constant 0 : i32
    %c0_i32_0 = arith.constant 0 : i32
    return %arg0, %c0_i32 : i32, i32
  }
  func.func @transform_1(%arg0: i32) -> (i32, i32) {
    %c0_i32 = arith.constant 0 : i32
    %c0_i32_0 = arith.constant 0 : i32
    %c0_i32_1 = arith.constant 0 : i32
    return %c0_i32, %c0_i32_0 : i32, i32
  }
  func.func @transform_2(%arg0: i32) -> (i32, i32) {
    %c0_i32 = arith.constant 0 : i32
    %c0_i32_0 = arith.constant 0 : i32
    return %arg0, %c0_i32 : i32, i32
  }
  func.func @transform_3(%arg0: i32) -> (i32, i32) {
    %c0_i32 = arith.constant 0 : i32
    %c0_i32_0 = arith.constant 0 : i32
    return %arg0, %c0_i32 : i32, i32
  }
}

</mosaic_0001>

<bundles_post_ra>
// kernel: tpu_custom_call.1
= control target key start
LH: loop header
LB: loop body
LE: loop exit
PB: predicated region body
PF: predicated region fallthrough
CT: control target
= control target key end

     0   :  { %9 = vsyncpa [#allocation3], 0  ;;  %s424_s0 = inlined_call_operand.hbm [shape: f32[16,32], index: 0, kind: input, shape index: {}]   ;;  %s425_s1 = inlined_call_operand.hbm [shape: f32[32,128], index: 1, kind: input, shape index: {}]   ;;  %s426_s2 = inlined_call_operand.vmem [shape: s32[16,2], index: 2, kind: output, shape index: {0}]   ;;  %s427_s3 = inlined_call_operand.vmem [shape: f32[16,2], index: 3, kind: output, shape index: {1}]  }
   0x1   :  { %10 = vsyncpa [#allocation5], 0  ;;  %s350_s12 = smov [#allocation2]  }
   0x2   :  { %s16_s13 = sshll.u32 %s350_s12, 4  ;;  %s17_s13 = int_to_ptr.vmem [resolvable:$true] %s16_s13 }
   0x3   :  { %s314_s14 = scalar_lea.vmem %s17_s13, 256  ;;  %p319_p1 = scmp.lt.s32.totalorder %s17_s13, %s17_s13 }
   0x4   :  { %p315_p0 = scmp.ne.s32.totalorder %s17_s13, %s314_s14  ;;  %p320_p2 = scmp.lt.s32.totalorder %s314_s14, %s314_s14 }
   0x6   :  { %p321_p3 = por %p320_p2, %p319_p1 }
   0x8   :  { %p322_p4 = pnand %p321_p3, %p315_p0 }
   0xa   :  { %325 = shalt.err (!%p322_p4)
}
   0xb   :  { %s351_s15 = smov 128   ;;  %s352_s16 = smov 8  }
   0xc   :  { %22 = dma.hbm_to_vmem [thread:$0]  %s424_s0, 256, %s17_s13, [#allocation3], %s351_s15, %s351_s15, %s352_s16  }
   0xd   :  { %s353_s19 = smov [#allocation4]  }
   0xe   :  { %s28_s20 = sshll.u32 %s353_s19, 4  ;;  %s29_s20 = int_to_ptr.vmem [resolvable:$true] %s28_s20 }
   0xf   :  { %s334_s21 = scalar_lea.vmem %s29_s20, 512  ;;  %p339_p6 = scmp.lt.s32.totalorder %s29_s20, %s29_s20 }
  0x10   :  { %p335_p5 = scmp.ne.s32.totalorder %s29_s20, %s334_s21  ;;  %p340_p7 = scmp.lt.s32.totalorder %s334_s21, %s334_s21 }
  0x12   :  { %p341_p8 = por %p340_p7, %p339_p6 }
  0x14   :  { %p342_p9 = pnand %p341_p8, %p335_p5 }
  0x16   :  { %345 = shalt.err (!%p342_p9)
}
  0x17   :  { %34 = dma.hbm_to_vmem [thread:$0]  %s425_s1, 512, %s29_s20, [#allocation5], %s351_s15, %s351_s15, %s352_s16  }
  0x18   :  { %346 = dma.done.wait [#allocation3], 256  }
  0x19   :  { %347 = vsyncadd [#allocation3], 4294967040 }
  0x1a   :  { %348 = dma.done.wait [#allocation5], 512  }
  0x1b   :  { %349 = vsyncadd [#allocation5], 4294966784  ;;  %vm47_vm0 = vcmask 261120   ;;  %v46_v0 = vld [vmem:[#allocation4 + $0x18] sm:$0xff]  ;;  %v45_v1 = vld [vmem:[#allocation4 + $0x10] sm:$0xff]  ;;  %v129_v6 = vlaneseq  ;;  %v354_v40 = vmov 0  }
  0x1c   :  { %276 = vmatprep.subr.mxu0 %v46_v0  ;;  %v41_v2 = vld [vmem:[#allocation2] sm:$0xff]  ;;  %v44_v3 = vld [vmem:[#allocation4 + $0x8] sm:$0xff]  ;;  %v43_v4 = vld [vmem:[#allocation4] sm:$0xff]  ;;  %292 = vset.pattern.permute.xlu0 %v354_v40  ;;  %vm210_vm8 = vcmask 7168   ;;  %vm231_vm11 = vcmask 15360  }
  0x1d   :  { %277 = vmatpush3.msra.mxu0 %v46_v0  ;;  %284 = vmatprep.mubr.msk.f32.mxu0 %vm47_vm0, %v41_v2  ;;  %v42_v5 = vld [vmem:[#allocation2 + $0x8] sm:$0xff]  ;;  %v383_v7 = vand.u32 127, %v129_v6 }
  0x1e   :  { %278 = vmatprep.subr.mxu0 %v45_v1  ;;  %293 = vset.pattern.permute.xlu1 %v354_v40 }
  0x1f   :  { %279 = vmatpush3.msra.mxu0 %v45_v1  ;;  %vm131_vm1 = vcmp.lt.s32.totalorder %v383_v7, 8 }
  0x20   :  { %280 = vmatprep.subr.mxu0 %v44_v3 }
  0x21   :  { %281 = vmatpush3.msra.mxu0 %v44_v3 }
  0x22   :  { %282 = vmatprep.subr.mxu0 %v43_v4 }
  0x23   :  { %283 = vmatpush3.msra.mxu0 %v43_v4 }
  0x24   :  { %285 = vmatmul.mubr.msk.f32.vlgmr.msra.gmra.mxu0 %vm47_vm0, %v42_v5 }
  0xe4   :  { %v286_v8 = vpop.f32.mrf.mxu0 }
  0xe5   :  { %v133_v11 = vsel %vm131_vm1, %v286_v8, -inf }
  0xe6   :  { %v120_v9 = vpop.f32.mrf.mxu0 }
  0xe7   :  { %v132_v10 = vsel %vm131_vm1, %v120_v9, -inf }
  0xe8   :  { %134 = vmax.xlane.f32.xlu0 %v132_v10 }
  0xec   :  { %136 = vmax.xlane.f32.xlu0 %v133_v11 }
 0x171   :  { %v135_v12 = vpop.xlane.xlu0 %134 }
 0x172   :  { %vm138_vm2 = vcmp.eq.f32.partialorder %v132_v10, %v135_v12 }
 0x173   :  { %v140_v13 = vsel %vm138_vm2, %v383_v7, 128 }
 0x174   :  { %v143_v14 = vshra.s32 %v140_v13, 16  ;;  %v142_v20 = vand.u32 65535, %v140_v13 }
 0x175   :  { %v137_v15 = vpop.xlane.xlu0 %136 }
 0x176   :  { %vm139_vm3 = vcmp.eq.f32.partialorder %v133_v11, %v137_v15  ;;  %v145_v16 = vcvt.s32.f32 %v143_v14  ;;  %v144_v22 = vcvt.s32.f32 %v142_v20 }
 0x177   :  { %v141_v17 = vsel %vm139_vm3, %v383_v7, 128 }
 0x178   :  { %146 = vmin.xlane.f32.xlu1 %v145_v16  ;;  %v157_v18 = vshra.s32 %v141_v17, 16  ;;  %v156_v23 = vand.u32 65535, %v141_v17 }
 0x17a   :  { %v159_v19 = vcvt.s32.f32 %v157_v18  ;;  %v158_v26 = vcvt.s32.f32 %v156_v23 }
 0x17c   :  { %160 = vmin.xlane.f32.xlu1 %v159_v19 }
 0x201   :  { %v147_v21 = vpop.xlane.xlu1 %146 }
 0x202   :  { %vm148_vm4 = vcmp.eq.f32.partialorder %v145_v16, %v147_v21  ;;  %v153_v28 = vcvt.f32.s32 %v147_v21 }
 0x203   :  { %v149_v24 = vsel %vm148_vm4, %v144_v22, inf }
 0x204   :  { %150 = vmin.xlane.f32.xlu0 %v149_v24  ;;  %v154_v30 = vshll.u32 %v153_v28, 16 }
 0x205   :  { %v161_v25 = vpop.xlane.xlu1 %160 }
 0x206   :  { %vm162_vm5 = vcmp.eq.f32.partialorder %v159_v19, %v161_v25  ;;  %v167_v31 = vcvt.f32.s32 %v161_v25 }
 0x207   :  { %v163_v27 = vsel %vm162_vm5, %v158_v26, inf }
 0x208   :  { %164 = vmin.xlane.f32.xlu1 %v163_v27  ;;  %v168_v35 = vshll.u32 %v167_v31, 16 }
 0x28d   :  { %v151_v29 = vpop.xlane.xlu0 %150 }
 0x28e   :  { %v152_v32 = vcvt.f32.s32 %v151_v29 }
 0x290   :  { %v388_v33 = vadd.s32 %v154_v30, %v152_v32 }
 0x291   :  { %v165_v34 = vpop.xlane.xlu1 %164 }
 0x292   :  { %v166_v36 = vcvt.f32.s32 %v165_v34  ;;  %vm170_vm6 = vcmp.eq.s32.totalorder %v383_v7, %v388_v33 }
 0x293   :  { %v172_v37 = vsel %vm170_vm6, -inf, %v132_v10 }
 0x294   :  { %v392_v38 = vadd.s32 %v168_v35, %v166_v36  ;;  %174 = vmax.xlane.f32.xlu0 %v172_v37 }
 0x296   :  { %vm171_vm7 = vcmp.eq.s32.totalorder %v383_v7, %v392_v38 }
 0x297   :  { %v173_v39 = vsel %vm171_vm7, -inf, %v133_v11 }
 0x298   :  { %176 = vmax.xlane.f32.xlu1 %v173_v39 }
 0x31d   :  { %v175_v41 = vpop.xlane.xlu0 %174 }
 0x31e   :  { %v211_v42 = vsel %vm210_vm8, %v135_v12, %v175_v41  ;;  %vm178_vm9 = vcmp.eq.f32.partialorder %v172_v37, %v175_v41 }
 0x31f   :  { %217 = vperm.xlu0 %292, %v211_v42   ;;  %v180_v51 = vsel %vm178_vm9, %v383_v7, 128 }
 0x320   :  { %v183_v53 = vshra.s32 %v180_v51, 16  ;;  %v182_v5 = vand.u32 65535, %v180_v51 }
 0x321   :  { %v177_v43 = vpop.xlane.xlu1 %176 }
 0x322   :  { %v212_v44 = vsel %vm210_vm8, %v137_v15, %v177_v43  ;;  %vm179_vm10 = vcmp.eq.f32.partialorder %v173_v39, %v177_v43  ;;  %v185_v57 = vcvt.s32.f32 %v183_v53  ;;  %v184_v8 = vcvt.s32.f32 %v182_v5 }
 0x323   :  { %222 = vperm.xlu1 %293, %v212_v44   ;;  %v181_v54 = vsel %vm179_vm10, %v383_v7, 128 }
 0x324   :  { %v197_v58 = vshra.s32 %v181_v54, 16  ;;  %v196_v9 = vand.u32 65535, %v181_v54 }
 0x326   :  { %v199_v60 = vcvt.s32.f32 %v197_v58  ;;  %v198_v11 = vcvt.s32.f32 %v196_v9 }
 0x39a   :  { %v218_v45 = vpop.permute.xlu0 %217 }
 0x39b   :  { %v225_v46 = vsub.f32 %v211_v42, %v218_v45 }
 0x39d   :  { %v227_v47 = vmul.f32 1.442695, %v225_v46 }
 0x39e   :  { %v223_v48 = vpop.permute.xlu1 %222 }
 0x39f   :  { %294 = vpow2.f32 %v227_v47  ;;  %v226_v49 = vsub.f32 %v212_v44, %v223_v48 }
 0x3a1   :  { %v229_v50 = vmul.f32 1.442695, %v226_v49 }
 0x3a3   :  { %296 = vpow2.f32 %v229_v50 }
 0x3ac   :  { %v295_v52 = vpop.eup %294 }
 0x3ad   :  { %v232_v55 = vsel %vm231_vm11, %v295_v52, 0.0 }
 0x3ae   :  { %233 = vadd.xlane.f32.xlu1 %v232_v55 }
 0x3b0   :  { %v297_v56 = vpop.eup %296 }
 0x3b1   :  { %v235_v59 = vsel %vm231_vm11, %v297_v56, 0.0 }
 0x3b2   :  { %236 = vadd.xlane.f32.xlu0 %v235_v59  ;;  %186 = vmin.xlane.f32.xlu1 %v185_v57 }
 0x3b6   :  { %200 = vmin.xlane.f32.xlu1 %v199_v60 }
 0x437   :  { %v234_v61 = vpop.xlane.xlu1 %233 }
 0x438   :  { %298 = vrcp.f32 %v234_v61 }
 0x43b   :  { %v237_v62 = vpop.xlane.xlu0 %236  ;;  %v187_v1 = vpop.xlane.xlu1 %186 }
 0x43c   :  { %300 = vrcp.f32 %v237_v62  ;;  %vm188_vm12 = vcmp.eq.f32.partialorder %v185_v57, %v187_v1  ;;  %v193_v16 = vcvt.f32.s32 %v187_v1 }
 0x43d   :  { %v189_v10 = vsel %vm188_vm12, %v184_v8, inf }
 0x43e   :  { %v194_v19 = vshll.u32 %v193_v16, 16 }
 0x43f   :  { %v201_v7 = vpop.xlane.xlu1 %200 }
 0x440   :  { %vm202_vm13 = vcmp.eq.f32.partialorder %v199_v60, %v201_v7  ;;  %v207_v20 = vcvt.f32.s32 %v201_v7 }
 0x441   :  { %v203_v12 = vsel %vm202_vm13, %v198_v11, inf }
 0x442   :  { %v208_v24 = vshll.u32 %v207_v20, 16 }
 0x445   :  { %v299_v63 = vpop.eup %298 }
 0x446   :  { %v239_v0 = vmul.f32 %v299_v63, %v295_v52 }
 0x448   :  { %v242_v2 = vsel %vm231_vm11, %v239_v0, 0.0 }
 0x449   :  { %v301_v3 = vpop.eup %300  ;;  %243 = vadd.xlane.f32.xlu1 %v242_v2 }
 0x44a   :  { %v241_v4 = vmul.f32 %v301_v3, %v297_v56 }
 0x44c   :  { %v245_v6 = vsel %vm231_vm11, %v241_v4, 0.0 }
 0x44d   :  { %246 = vadd.xlane.f32.xlu1 %v245_v6 }
 0x451   :  { %190 = vmin.xlane.f32.xlu1 %v189_v10 }
 0x455   :  { %204 = vmin.xlane.f32.xlu1 %v203_v12 }
 0x4d2   :  { %v244_v13 = vpop.xlane.xlu1 %243 }
 0x4d3   :  { %v248_v14 = vadd.f32 1e-20, %v244_v13 }
 0x4d5   :  { %302 = vrcp.f32 %v248_v14 }
 0x4d6   :  { %v247_v15 = vpop.xlane.xlu1 %246 }
 0x4d7   :  { %v249_v17 = vadd.f32 1e-20, %v247_v15 }
 0x4d9   :  { %304 = vrcp.f32 %v249_v17 }
 0x4da   :  { %v191_v18 = vpop.xlane.xlu1 %190 }
 0x4db   :  { %v192_v21 = vcvt.f32.s32 %v191_v18 }
 0x4dd   :  { %v195_v22 = vadd.s32 %v194_v19, %v192_v21 }
 0x4de   :  { %v205_v23 = vpop.xlane.xlu1 %204 }
 0x4df   :  { %v213_v25 = vsel %vm210_vm8, %v388_v33, %v195_v22  ;;  %v206_v26 = vcvt.f32.s32 %v205_v23 }
 0x4e0   :  { %254 = vst.msk [vmem:[%s426_s2] sm:$0xff] %vm231_vm11, %v213_v25 }
 0x4e1   :  { %v209_v27 = vadd.s32 %v208_v24, %v206_v26 }
 0x4e2   :  { %v303_v28 = vpop.eup %302 }
 0x4e3   :  { %v251_v29 = vmul.f32 %v303_v28, %v239_v0  ;;  %v214_v30 = vsel %vm210_vm8, %v392_v38, %v209_v27 }
 0x4e4   :  { %255 = vst.msk [vmem:[%s426_s2 + $0x8] sm:$0xff] %vm231_vm11, %v214_v30 }
 0x4e5   :  { %256 = vst.msk [vmem:[%s427_s3] sm:$0xff] %vm231_vm11, %v251_v29 }
 0x4e6   :  { %v305_v31 = vpop.eup %304 }
 0x4e7   :  { %v253_v32 = vmul.f32 %v305_v31, %v241_v4 }
 0x4e9   :  { %257 = vst.msk [vmem:[%s427_s3 + $0x8] sm:$0xff] %vm231_vm11, %v253_v32 }
 0x4ea   :  { %266 = vsyncpa [#allocation3], 1 }
 0x4eb   :  { %267 = vsyncpa [#allocation5], 1 }

// kernel: tpu_custom_call.1
= control target key start
LH: loop header
LB: loop body
LE: loop exit
PB: predicated region body
PF: predicated region fallthrough
CT: control target
= control target key end

     0   :  { %9 = vsyncpa [#allocation3], 0  ;;  %s424_s0 = inlined_call_operand.hbm [shape: f32[16,32], index: 0, kind: input, shape index: {}]   ;;  %s425_s1 = inlined_call_operand.hbm [shape: f32[32,128], index: 1, kind: input, shape index: {}]   ;;  %s426_s2 = inlined_call_operand.vmem [shape: s32[16,2], index: 2, kind: output, shape index: {0}]   ;;  %s427_s3 = inlined_call_operand.vmem [shape: f32[16,2], index: 3, kind: output, shape index: {1}]  }
   0x1   :  { %10 = vsyncpa [#allocation5], 0  ;;  %s350_s12 = smov [#allocation2]  }
   0x2   :  { %s16_s13 = sshll.u32 %s350_s12, 4  ;;  %s17_s13 = int_to_ptr.vmem [resolvable:$true] %s16_s13 }
   0x3   :  { %s314_s14 = scalar_lea.vmem %s17_s13, 256  ;;  %p319_p1 = scmp.lt.s32.totalorder %s17_s13, %s17_s13 }
   0x4   :  { %p315_p0 = scmp.ne.s32.totalorder %s17_s13, %s314_s14  ;;  %p320_p2 = scmp.lt.s32.totalorder %s314_s14, %s314_s14 }
   0x6   :  { %p321_p3 = por %p320_p2, %p319_p1 }
   0x8   :  { %p322_p4 = pnand %p321_p3, %p315_p0 }
   0xa   :  { %325 = shalt.err (!%p322_p4)
}
   0xb   :  { %s351_s15 = smov 128   ;;  %s352_s16 = smov 8  }
   0xc   :  { %22 = dma.hbm_to_vmem [thread:$0]  %s424_s0, 256, %s17_s13, [#allocation3], %s351_s15, %s351_s15, %s352_s16  }
   0xd   :  { %s353_s19 = smov [#allocation4]  }
   0xe   :  { %s28_s20 = sshll.u32 %s353_s19, 4  ;;  %s29_s20 = int_to_ptr.vmem [resolvable:$true] %s28_s20 }
   0xf   :  { %s334_s21 = scalar_lea.vmem %s29_s20, 512  ;;  %p339_p6 = scmp.lt.s32.totalorder %s29_s20, %s29_s20 }
  0x10   :  { %p335_p5 = scmp.ne.s32.totalorder %s29_s20, %s334_s21  ;;  %p340_p7 = scmp.lt.s32.totalorder %s334_s21, %s334_s21 }
  0x12   :  { %p341_p8 = por %p340_p7, %p339_p6 }
  0x14   :  { %p342_p9 = pnand %p341_p8, %p335_p5 }
  0x16   :  { %345 = shalt.err (!%p342_p9)
}
  0x17   :  { %34 = dma.hbm_to_vmem [thread:$0]  %s425_s1, 512, %s29_s20, [#allocation5], %s351_s15, %s351_s15, %s352_s16  }
  0x18   :  { %346 = dma.done.wait [#allocation3], 256  }
  0x19   :  { %347 = vsyncadd [#allocation3], 4294967040 }
  0x1a   :  { %348 = dma.done.wait [#allocation5], 512  }
  0x1b   :  { %349 = vsyncadd [#allocation5], 4294966784  ;;  %vm47_vm0 = vcmask 261120   ;;  %v46_v0 = vld [vmem:[#allocation4 + $0x18] sm:$0xff]  ;;  %v45_v1 = vld [vmem:[#allocation4 + $0x10] sm:$0xff]  ;;  %v129_v6 = vlaneseq  ;;  %v354_v40 = vmov 0  }
  0x1c   :  { %276 = vmatprep.subr.mxu0 %v46_v0  ;;  %v41_v2 = vld [vmem:[#allocation2] sm:$0xff]  ;;  %v44_v3 = vld [vmem:[#allocation4 + $0x8] sm:$0xff]  ;;  %v43_v4 = vld [vmem:[#allocation4] sm:$0xff]  ;;  %292 = vset.pattern.permute.xlu0 %v354_v40  ;;  %vm210_vm8 = vcmask 7168   ;;  %vm231_vm11 = vcmask 15360  }
  0x1d   :  { %277 = vmatpush3.msra.mxu0 %v46_v0  ;;  %284 = vmatprep.mubr.msk.f32.mxu0 %vm47_vm0, %v41_v2  ;;  %v42_v5 = vld [vmem:[#allocation2 + $0x8] sm:$0xff]  ;;  %v383_v7 = vand.u32 127, %v129_v6 }
  0x1e   :  { %278 = vmatprep.subr.mxu0 %v45_v1  ;;  %293 = vset.pattern.permute.xlu1 %v354_v40 }
  0x1f   :  { %279 = vmatpush3.msra.mxu0 %v45_v1  ;;  %vm131_vm1 = vcmp.lt.s32.totalorder %v383_v7, 8 }
  0x20   :  { %280 = vmatprep.subr.mxu0 %v44_v3 }
  0x21   :  { %281 = vmatpush3.msra.mxu0 %v44_v3 }
  0x22   :  { %282 = vmatprep.subr.mxu0 %v43_v4 }
  0x23   :  { %283 = vmatpush3.msra.mxu0 %v43_v4 }
  0x24   :  { %285 = vmatmul.mubr.msk.f32.vlgmr.msra.gmra.mxu0 %vm47_vm0, %v42_v5 }
  0xe4   :  { %v286_v8 = vpop.f32.mrf.mxu0 }
  0xe5   :  { %v133_v11 = vsel %vm131_vm1, %v286_v8, -inf }
  0xe6   :  { %v120_v9 = vpop.f32.mrf.mxu0 }
  0xe7   :  { %v132_v10 = vsel %vm131_vm1, %v120_v9, -inf }
  0xe8   :  { %134 = vmax.xlane.f32.xlu0 %v132_v10 }
  0xec   :  { %136 = vmax.xlane.f32.xlu0 %v133_v11 }
 0x171   :  { %v135_v12 = vpop.xlane.xlu0 %134 }
 0x172   :  { %vm138_vm2 = vcmp.eq.f32.partialorder %v132_v10, %v135_v12 }
 0x173   :  { %v140_v13 = vsel %vm138_vm2, %v383_v7, 128 }
 0x174   :  { %v143_v14 = vshra.s32 %v140_v13, 16  ;;  %v142_v20 = vand.u32 65535, %v140_v13 }
 0x175   :  { %v137_v15 = vpop.xlane.xlu0 %136 }
 0x176   :  { %vm139_vm3 = vcmp.eq.f32.partialorder %v133_v11, %v137_v15  ;;  %v145_v16 = vcvt.s32.f32 %v143_v14  ;;  %v144_v22 = vcvt.s32.f32 %v142_v20 }
 0x177   :  { %v141_v17 = vsel %vm139_vm3, %v383_v7, 128 }
 0x178   :  { %146 = vmin.xlane.f32.xlu1 %v145_v16  ;;  %v157_v18 = vshra.s32 %v141_v17, 16  ;;  %v156_v23 = vand.u32 65535, %v141_v17 }
 0x17a   :  { %v159_v19 = vcvt.s32.f32 %v157_v18  ;;  %v158_v26 = vcvt.s32.f32 %v156_v23 }
 0x17c   :  { %160 = vmin.xlane.f32.xlu1 %v159_v19 }
 0x201   :  { %v147_v21 = vpop.xlane.xlu1 %146 }
 0x202   :  { %vm148_vm4 = vcmp.eq.f32.partialorder %v145_v16, %v147_v21  ;;  %v153_v28 = vcvt.f32.s32 %v147_v21 }
 0x203   :  { %v149_v24 = vsel %vm148_vm4, %v144_v22, inf }
 0x204   :  { %150 = vmin.xlane.f32.xlu0 %v149_v24  ;;  %v154_v30 = vshll.u32 %v153_v28, 16 }
 0x205   :  { %v161_v25 = vpop.xlane.xlu1 %160 }
 0x206   :  { %vm162_vm5 = vcmp.eq.f32.partialorder %v159_v19, %v161_v25  ;;  %v167_v31 = vcvt.f32.s32 %v161_v25 }
 0x207   :  { %v163_v27 = vsel %vm162_vm5, %v158_v26, inf }
 0x208   :  { %164 = vmin.xlane.f32.xlu1 %v163_v27  ;;  %v168_v35 = vshll.u32 %v167_v31, 16 }
 0x28d   :  { %v151_v29 = vpop.xlane.xlu0 %150 }
 0x28e   :  { %v152_v32 = vcvt.f32.s32 %v151_v29 }
 0x290   :  { %v388_v33 = vadd.s32 %v154_v30, %v152_v32 }
 0x291   :  { %v165_v34 = vpop.xlane.xlu1 %164 }
 0x292   :  { %v166_v36 = vcvt.f32.s32 %v165_v34  ;;  %vm170_vm6 = vcmp.eq.s32.totalorder %v383_v7, %v388_v33 }
 0x293   :  { %v172_v37 = vsel %vm170_vm6, -inf, %v132_v10 }
 0x294   :  { %v392_v38 = vadd.s32 %v168_v35, %v166_v36  ;;  %174 = vmax.xlane.f32.xlu0 %v172_v37 }
 0x296   :  { %vm171_vm7 = vcmp.eq.s32.totalorder %v383_v7, %v392_v38 }
 0x297   :  { %v173_v39 = vsel %vm171_vm7, -inf, %v133_v11 }
 0x298   :  { %176 = vmax.xlane.f32.xlu1 %v173_v39 }
 0x31d   :  { %v175_v41 = vpop.xlane.xlu0 %174 }
 0x31e   :  { %v211_v42 = vsel %vm210_vm8, %v135_v12, %v175_v41  ;;  %vm178_vm9 = vcmp.eq.f32.partialorder %v172_v37, %v175_v41 }
 0x31f   :  { %217 = vperm.xlu0 %292, %v211_v42   ;;  %v180_v51 = vsel %vm178_vm9, %v383_v7, 128 }
 0x320   :  { %v183_v53 = vshra.s32 %v180_v51, 16  ;;  %v182_v5 = vand.u32 65535, %v180_v51 }
 0x321   :  { %v177_v43 = vpop.xlane.xlu1 %176 }
 0x322   :  { %v212_v44 = vsel %vm210_vm8, %v137_v15, %v177_v43  ;;  %vm179_vm10 = vcmp.eq.f32.partialorder %v173_v39, %v177_v43  ;;  %v185_v57 = vcvt.s32.f32 %v183_v53  ;;  %v184_v8 = vcvt.s32.f32 %v182_v5 }
 0x323   :  { %222 = vperm.xlu1 %293, %v212_v44   ;;  %v181_v54 = vsel %vm179_vm10, %v383_v7, 128 }
 0x324   :  { %v197_v58 = vshra.s32 %v181_v54, 16  ;;  %v196_v9 = vand.u32 65535, %v181_v54 }
 0x326   :  { %v199_v60 = vcvt.s32.f32 %v197_v58  ;;  %v198_v11 = vcvt.s32.f32 %v196_v9 }
 0x39a   :  { %v218_v45 = vpop.permute.xlu0 %217 }
 0x39b   :  { %v225_v46 = vsub.f32 %v211_v42, %v218_v45 }
 0x39d   :  { %v227_v47 = vmul.f32 1.442695, %v225_v46 }
 0x39e   :  { %v223_v48 = vpop.permute.xlu1 %222 }
 0x39f   :  { %294 = vpow2.f32 %v227_v47  ;;  %v226_v49 = vsub.f32 %v212_v44, %v223_v48 }
 0x3a1   :  { %v229_v50 = vmul.f32 1.442695, %v226_v49 }
 0x3a3   :  { %296 = vpow2.f32 %v229_v50 }
 0x3ac   :  { %v295_v52 = vpop.eup %294 }
 0x3ad   :  { %v232_v55 = vsel %vm231_vm11, %v295_v52, 0.0 }
 0x3ae   :  { %233 = vadd.xlane.f32.xlu1 %v232_v55 }
 0x3b0   :  { %v297_v56 = vpop.eup %296 }
 0x3b1   :  { %v235_v59 = vsel %vm231_vm11, %v297_v56, 0.0 }
 0x3b2   :  { %236 = vadd.xlane.f32.xlu0 %v235_v59  ;;  %186 = vmin.xlane.f32.xlu1 %v185_v57 }
 0x3b6   :  { %200 = vmin.xlane.f32.xlu1 %v199_v60 }
 0x437   :  { %v234_v61 = vpop.xlane.xlu1 %233 }
 0x438   :  { %298 = vrcp.f32 %v234_v61 }
 0x43b   :  { %v237_v62 = vpop.xlane.xlu0 %236  ;;  %v187_v1 = vpop.xlane.xlu1 %186 }
 0x43c   :  { %300 = vrcp.f32 %v237_v62  ;;  %vm188_vm12 = vcmp.eq.f32.partialorder %v185_v57, %v187_v1  ;;  %v193_v16 = vcvt.f32.s32 %v187_v1 }
 0x43d   :  { %v189_v10 = vsel %vm188_vm12, %v184_v8, inf }
 0x43e   :  { %v194_v19 = vshll.u32 %v193_v16, 16 }
 0x43f   :  { %v201_v7 = vpop.xlane.xlu1 %200 }
 0x440   :  { %vm202_vm13 = vcmp.eq.f32.partialorder %v199_v60, %v201_v7  ;;  %v207_v20 = vcvt.f32.s32 %v201_v7 }
 0x441   :  { %v203_v12 = vsel %vm202_vm13, %v198_v11, inf }
 0x442   :  { %v208_v24 = vshll.u32 %v207_v20, 16 }
 0x445   :  { %v299_v63 = vpop.eup %298 }
 0x446   :  { %v239_v0 = vmul.f32 %v299_v63, %v295_v52 }
 0x448   :  { %v242_v2 = vsel %vm231_vm11, %v239_v0, 0.0 }
 0x449   :  { %v301_v3 = vpop.eup %300  ;;  %243 = vadd.xlane.f32.xlu1 %v242_v2 }
 0x44a   :  { %v241_v4 = vmul.f32 %v301_v3, %v297_v56 }
 0x44c   :  { %v245_v6 = vsel %vm231_vm11, %v241_v4, 0.0 }
 0x44d   :  { %246 = vadd.xlane.f32.xlu1 %v245_v6 }
 0x451   :  { %190 = vmin.xlane.f32.xlu1 %v189_v10 }
 0x455   :  { %204 = vmin.xlane.f32.xlu1 %v203_v12 }
 0x4d2   :  { %v244_v13 = vpop.xlane.xlu1 %243 }
 0x4d3   :  { %v248_v14 = vadd.f32 1e-20, %v244_v13 }
 0x4d5   :  { %302 = vrcp.f32 %v248_v14 }
 0x4d6   :  { %v247_v15 = vpop.xlane.xlu1 %246 }
 0x4d7   :  { %v249_v17 = vadd.f32 1e-20, %v247_v15 }
 0x4d9   :  { %304 = vrcp.f32 %v249_v17 }
 0x4da   :  { %v191_v18 = vpop.xlane.xlu1 %190 }
 0x4db   :  { %v192_v21 = vcvt.f32.s32 %v191_v18 }
 0x4dd   :  { %v195_v22 = vadd.s32 %v194_v19, %v192_v21 }
 0x4de   :  { %v205_v23 = vpop.xlane.xlu1 %204 }
 0x4df   :  { %v213_v25 = vsel %vm210_vm8, %v388_v33, %v195_v22  ;;  %v206_v26 = vcvt.f32.s32 %v205_v23 }
 0x4e0   :  { %254 = vst.msk [vmem:[%s426_s2] sm:$0xff] %vm231_vm11, %v213_v25 }
 0x4e1   :  { %v209_v27 = vadd.s32 %v208_v24, %v206_v26 }
 0x4e2   :  { %v303_v28 = vpop.eup %302 }
 0x4e3   :  { %v251_v29 = vmul.f32 %v303_v28, %v239_v0  ;;  %v214_v30 = vsel %vm210_vm8, %v392_v38, %v209_v27 }
 0x4e4   :  { %255 = vst.msk [vmem:[%s426_s2 + $0x8] sm:$0xff] %vm231_vm11, %v214_v30 }
 0x4e5   :  { %256 = vst.msk [vmem:[%s427_s3] sm:$0xff] %vm231_vm11, %v251_v29 }
 0x4e6   :  { %v305_v31 = vpop.eup %304 }
 0x4e7   :  { %v253_v32 = vmul.f32 %v305_v31, %v241_v4 }
 0x4e9   :  { %257 = vst.msk [vmem:[%s427_s3 + $0x8] sm:$0xff] %vm231_vm11, %v253_v32 }
 0x4ea   :  { %266 = vsyncpa [#allocation3], 1 }
 0x4eb   :  { %267 = vsyncpa [#allocation5], 1 }

</bundles_post_ra>
